<compile_context>
chip_gen: v5e
topology: v5e:2x2
jax: 0.10.0
libtpu: 0.0.40
codegen_flags: <defaults>
</compile_context>

<pallas_src>
import functools

import jax
import jax.numpy as jnp
from jax.experimental import pallas as pl
from jax.experimental.pallas import tpu as pltpu


# ----------------------------- Pallas kernel --------------------------------
def chebnet_kernel(L_ref, xT_ref, w1T_ref, b1_ref, w2T_ref, b2_ref, outT_ref,
                   *, K):
    """Fused 2-layer ChebConv forward, node-minor (lane = N) layout.

    L_ref   : [N, N]        bf16, symmetric scaled Laplacian
    xT_ref  : [Fin, N]      f32, X^T
    w1T_ref : [Hid, K*Fin]  bf16, layer-1 weights, pre-flattened+transposed
    b1_ref  : [Hid, 1]      f32
    w2T_ref : [Out, K*Hid]  bf16
    b2_ref  : [Out, 1]      f32
    outT_ref: [Out, N]      f32 output (transposed)
    """
    L = L_ref[...]  # [N, N] bf16

    def cheb_layer(zT, wT, b, apply_relu):
        # zT: [Fin, N] f32.  Build the stacked Chebyshev basis [K*Fin, N].
        tx_prev = zT                                   # T_0(L) X  (transposed)
        txs = [tx_prev]
        if K > 1:
            # T_1(L) X  ->  X^T @ L   (L symmetric)
            tx_cur = jnp.dot(tx_prev.astype(jnp.bfloat16), L,
                             preferred_element_type=jnp.float32)
            txs.append(tx_cur)
            # T_k = 2 L T_{k-1} - T_{k-2}
            for _ in range(2, K):
                tx_new = 2.0 * jnp.dot(tx_cur.astype(jnp.bfloat16), L,
                                       preferred_element_type=jnp.float32) \
                         - tx_prev
                txs.append(tx_new)
                tx_prev, tx_cur = tx_cur, tx_new

        t_stack = jnp.concatenate(txs, axis=0)         # [K*Fin, N] f32
        # Single fused projection: [Fout, K*Fin] @ [K*Fin, N] -> [Fout, N]
        out = jnp.dot(wT, t_stack.astype(jnp.bfloat16),
                      preferred_element_type=jnp.float32) + b
        if apply_relu:
            out = jnp.maximum(out, 0.0)
        return out

    hT = cheb_layer(xT_ref[...], w1T_ref[...], b1_ref[...], apply_relu=True)
    outT = cheb_layer(hT, w2T_ref[...], b2_ref[...], apply_relu=False)
    outT_ref[...] = outT.astype(outT_ref.dtype)        # single lane-dense store


def chebnet_forward(x, L_hat, params):
    """Full ChebNet forward (dropout = identity in eval mode)."""
    N, in_c = x.shape
    K, _, hid_c = params["w1"].shape
    _, _, out_c = params["w2"].shape

    # One-time layout / dtype prep (tiny XLA ops outside the kernel).
    L_bf16 = L_hat.astype(jnp.bfloat16)                        # [N, N]
    xT = jnp.transpose(x)                                      # [Fin, N]
    w1T = jnp.transpose(params["w1"].reshape(K * in_c, hid_c)) \
             .astype(jnp.bfloat16)                             # [Hid, K*Fin]
    w2T = jnp.transpose(params["w2"].reshape(K * hid_c, out_c)) \
             .astype(jnp.bfloat16)                             # [Out, K*Hid]
    b1 = params["b1"].reshape(hid_c, 1).astype(jnp.float32)
    b2 = params["b2"].reshape(out_c, 1).astype(jnp.float32)

    kern = functools.partial(chebnet_kernel, K=K)
    outT = pl.pallas_call(
        kern,
        out_shape=jax.ShapeDtypeStruct((out_c, N), jnp.float32),
        in_specs=[pl.BlockSpec(memory_space=pltpu.MemorySpace.VMEM)] * 6,
        out_specs=pl.BlockSpec(memory_space=pltpu.MemorySpace.VMEM),
    )(L_bf16, xT, w1T, b1, w2T, b2)
    return jnp.transpose(outT)                                 # [N, Out]


# ------------------------------- glue (JAX) ---------------------------------
def build_scaled_laplacian(num_nodes, edge_index, edge_weight, lambda_max=2.0):
    """Dense L_hat = (2/lambda_max) * (I - D^{-1/2} A D^{-1/2}) - I  (PyG sym).

    Assumes edge_index lists each undirected edge once (as the synthetic graph
    below does); both directions are accumulated here.
    """
    src, dst = edge_index
    A = jnp.zeros((num_nodes, num_nodes), dtype=jnp.float32)
    A = A.at[src, dst].add(edge_weight)
    A = A.at[dst, src].add(edge_weight)
    deg = jnp.sum(A, axis=1)
    deg_inv_sqrt = jnp.where(deg > 0, 1.0 / jnp.sqrt(deg), 0.0)
    A_norm = deg_inv_sqrt[:, None] * A * deg_inv_sqrt[None, :]
    L = jnp.eye(num_nodes, dtype=jnp.float32) - A_norm
    L_hat = (2.0 / lambda_max) * L - jnp.eye(num_nodes, dtype=jnp.float32)
    return L_hat


def glorot(key, shape):
    fan_in, fan_out = shape[-2], shape[-1]
    limit = jnp.sqrt(6.0 / (fan_in + fan_out))
    return jax.random.uniform(key, shape, jnp.float32, -limit, limit)


# --------------------------------- main --------------------------------------
if __name__ == "__main__":
    key = jax.random.PRNGKey(0)

    # Small synthetic graph (deterministic ring-like, ~watts-strogatz k=4 w/o rewiring)
    N = 128              # nodes
    IN_C, HID_C, OUT_C, K = 16, 32, 8, 3

    nodes = jnp.arange(N, dtype=jnp.int32)
    src = jnp.concatenate([nodes, nodes])
    dst = jnp.concatenate([(nodes + 1) % N, (nodes + 2) % N])
    edge_index = jnp.stack([src, dst], axis=0)          # [2, 2N]

    k_ew, k_x, k_w1, k_b1, k_w2, k_b2 = jax.random.split(key, 6)
    edge_weight = jax.random.uniform(k_ew, (edge_index.shape[1],),
                                     jnp.float32, 0.1, 1.0)

    L_hat = build_scaled_laplacian(N, edge_index, edge_weight)

    x = jax.random.normal(k_x, (N, IN_C), jnp.float32)

    params = {
        "w1": glorot(k_w1, (K, IN_C, HID_C)),
        "b1": jnp.zeros((HID_C,), jnp.float32) + 0.01 * jax.random.normal(k_b1, (HID_C,)),
        "w2": glorot(k_w2, (K, HID_C, OUT_C)),
        "b2": jnp.zeros((OUT_C,), jnp.float32) + 0.01 * jax.random.normal(k_b2, (OUT_C,)),
    }

    out = chebnet_forward(x, L_hat, params)
    jax.block_until_ready(out)
    assert out.shape == (N, OUT_C), out.shape
    print("KERNEL_OK")
</pallas_src>

<mosaic_0001>
module attributes {stable_mosaic.version = 11 : i64} {
  func.func @chebnet_kernel(%arg0: memref<128x128xbf16, #tpu.memory_space<vmem>>, %arg1: memref<16x128xf32, #tpu.memory_space<vmem>>, %arg2: memref<32x48xbf16, #tpu.memory_space<vmem>>, %arg3: memref<32x1xf32, #tpu.memory_space<vmem>>, %arg4: memref<8x96xbf16, #tpu.memory_space<vmem>>, %arg5: memref<8x1xf32, #tpu.memory_space<vmem>>, %arg6: memref<8x128xf32, #tpu.memory_space<vmem>>) attributes {dimension_semantics = [], scalar_prefetch = 0 : i64, scratch_operands = 0 : i64, tpu.core_type = #tpu.core_type<tc>} {
    %c0 = arith.constant 0 : index
    %c0_0 = arith.constant 0 : index
    %0 = vector.load %arg0[%c0, %c0_0] : memref<128x128xbf16, #tpu.memory_space<vmem>>, vector<128x128xbf16>
    %c0_1 = arith.constant 0 : index
    %c0_2 = arith.constant 0 : index
    %1 = vector.load %arg1[%c0_1, %c0_2] : memref<16x128xf32, #tpu.memory_space<vmem>>, vector<16x128xf32>
    %c0_3 = arith.constant 0 : index
    %c0_4 = arith.constant 0 : index
    %2 = vector.load %arg2[%c0_3, %c0_4] : memref<32x48xbf16, #tpu.memory_space<vmem>>, vector<32x48xbf16>
    %c0_5 = arith.constant 0 : index
    %c0_6 = arith.constant 0 : index
    %3 = vector.load %arg3[%c0_5, %c0_6] : memref<32x1xf32, #tpu.memory_space<vmem>>, vector<32x1xf32>
    %4 = arith.truncf %1 : vector<16x128xf32> to vector<16x128xbf16>
    %cst = arith.constant dense<0.000000e+00> : vector<16x128xf32>
    %5 = tpu.matmul %4, %0, %cst {dimension_numbers = #tpu.dot_dimension_numbers<[1], [0], [0], [1], [0, 0, 1, 1], [], []>} : vector<16x128xbf16>, vector<128x128xbf16>, vector<16x128xf32> -> vector<16x128xf32>
    %6 = arith.truncf %5 : vector<16x128xf32> to vector<16x128xbf16>
    %cst_7 = arith.constant dense<0.000000e+00> : vector<16x128xf32>
    %7 = tpu.matmul %6, %0, %cst_7 {dimension_numbers = #tpu.dot_dimension_numbers<[1], [0], [0], [1], [0, 0, 1, 1], [], []>} : vector<16x128xbf16>, vector<128x128xbf16>, vector<16x128xf32> -> vector<16x128xf32>
    %cst_8 = arith.constant 2.000000e+00 : f32
    %8 = vector.broadcast %cst_8 : f32 to vector<16x128xf32>
    %9 = arith.mulf %8, %7 : vector<16x128xf32>
    %10 = arith.subf %9, %1 : vector<16x128xf32>
    %11 = tpu.concatenate %1, %5, %10 in 0 : vector<16x128xf32>, vector<16x128xf32>, vector<16x128xf32> -> vector<48x128xf32>
    %12 = arith.truncf %11 : vector<48x128xf32> to vector<48x128xbf16>
    %cst_9 = arith.constant dense<0.000000e+00> : vector<32x128xf32>
    %13 = tpu.matmul %2, %12, %cst_9 {dimension_numbers = #tpu.dot_dimension_numbers<[1], [0], [0], [1], [0, 0, 1, 1], [], []>} : vector<32x48xbf16>, vector<48x128xbf16>, vector<32x128xf32> -> vector<32x128xf32>
    %14 = vector.broadcast %3 : vector<32x1xf32> to vector<32x128xf32>
    %15 = arith.addf %13, %14 : vector<32x128xf32>
    %cst_10 = arith.constant 0.000000e+00 : f32
    %16 = vector.broadcast %cst_10 : f32 to vector<32x128xf32>
    %17 = arith.maximumf %15, %16 : vector<32x128xf32>
    %c0_11 = arith.constant 0 : index
    %c0_12 = arith.constant 0 : index
    %18 = vector.load %arg4[%c0_11, %c0_12] : memref<8x96xbf16, #tpu.memory_space<vmem>>, vector<8x96xbf16>
    %c0_13 = arith.constant 0 : index
    %c0_14 = arith.constant 0 : index
    %19 = vector.load %arg5[%c0_13, %c0_14] : memref<8x1xf32, #tpu.memory_space<vmem>>, vector<8x1xf32>
    %20 = arith.truncf %17 : vector<32x128xf32> to vector<32x128xbf16>
    %cst_15 = arith.constant dense<0.000000e+00> : vector<32x128xf32>
    %21 = tpu.matmul %20, %0, %cst_15 {dimension_numbers = #tpu.dot_dimension_numbers<[1], [0], [0], [1], [0, 0, 1, 1], [], []>} : vector<32x128xbf16>, vector<128x128xbf16>, vector<32x128xf32> -> vector<32x128xf32>
    %22 = arith.truncf %21 : vector<32x128xf32> to vector<32x128xbf16>
    %cst_16 = arith.constant dense<0.000000e+00> : vector<32x128xf32>
    %23 = tpu.matmul %22, %0, %cst_16 {dimension_numbers = #tpu.dot_dimension_numbers<[1], [0], [0], [1], [0, 0, 1, 1], [], []>} : vector<32x128xbf16>, vector<128x128xbf16>, vector<32x128xf32> -> vector<32x128xf32>
    %cst_17 = arith.constant 2.000000e+00 : f32
    %24 = vector.broadcast %cst_17 : f32 to vector<32x128xf32>
    %25 = arith.mulf %24, %23 : vector<32x128xf32>
    %26 = arith.subf %25, %17 : vector<32x128xf32>
    %27 = tpu.concatenate %17, %21, %26 in 0 : vector<32x128xf32>, vector<32x128xf32>, vector<32x128xf32> -> vector<96x128xf32>
    %28 = arith.truncf %27 : vector<96x128xf32> to vector<96x128xbf16>
    %cst_18 = arith.constant dense<0.000000e+00> : vector<8x128xf32>
    %29 = tpu.matmul %18, %28, %cst_18 {dimension_numbers = #tpu.dot_dimension_numbers<[1], [0], [0], [1], [0, 0, 1, 1], [], []>} : vector<8x96xbf16>, vector<96x128xbf16>, vector<8x128xf32> -> vector<8x128xf32>
    %30 = vector.broadcast %19 : vector<8x1xf32> to vector<8x128xf32>
    %31 = arith.addf %29, %30 : vector<8x128xf32>
    %c0_19 = arith.constant 0 : index
    %c0_20 = arith.constant 0 : index
    %32 = vector.load %arg6[%c0_19, %c0_20] : memref<8x128xf32, #tpu.memory_space<vmem>>, vector<8x128xf32>
    tpu.vector_store %arg6[%c0_19, %c0_20], %31 {strides = array<i32>} : memref<8x128xf32, #tpu.memory_space<vmem>>, vector<8x128xf32>,
    return
  }
}

</mosaic_0001>

<bundles_post_ra>
// kernel: tpu_custom_call.1
= control target key start
LH: loop header
LB: loop body
LE: loop exit
PB: predicated region body
PF: predicated region fallthrough
CT: control target
= control target key end

     0   :  { %11 = vsyncpa [#allocation3], 0  ;;  %s505_s0 = inlined_call_operand.hbm [shape: bf16[128,128], index: 0, kind: input, shape index: {}]   ;;  %s506_s1 = inlined_call_operand.vmem [shape: f32[16,128], index: 1, kind: input, shape index: {}]   ;;  %s507_s2 = inlined_call_operand.vmem [shape: bf16[32,48], index: 2, kind: input, shape index: {}]   ;;  %s508_s3 = inlined_call_operand.vmem [shape: f32[32,1], index: 3, kind: input, shape index: {}]   ;;  %s509_s4 = inlined_call_operand.vmem [shape: bf16[8,96], index: 4, kind: input, shape index: {}]   ;;  %s510_s5 = inlined_call_operand.vmem [shape: f32[8,1], index: 5, kind: input, shape index: {}]   ;;  %s511_s6 = inlined_call_operand.hbm [shape: f32[8,128], index: 6, kind: output, shape index: {}]  }
   0x1   :  { %12 = vsyncpa [#allocation4], 0  ;;  %s17_s23 = sshll.u32 %s505_s0, 4  ;;  %s417_s24 = smov [#allocation2]   ;;  %s18_s23 = int_to_ptr.hbm [resolvable:$true] %s17_s23 }
   0x2   :  { %s19_s25 = sshll.u32 %s417_s24, 4  ;;  %s418_s26 = smov 64   ;;  %s20_s25 = int_to_ptr.vmem [resolvable:$true] %s19_s25 }
   0x3   :  { %s419_s27 = smov 4  }
   0x4   :  { %25 = dma.hbm_to_vmem [thread:$0]  %s18_s23, 1024, %s20_s25, [#allocation3], %s418_s26, %s418_s26, %s419_s27  }
   0x5   :  { %413 = dma.done.wait [#allocation3], 1024  }
   0x6   :  { %414 = vsyncadd [#allocation3], 4294966272  ;;  %v460_v0 = vld [vmem:[#allocation2 + $0x38] sm:$0xff]  ;;  %v463_v1 = vld [vmem:[#allocation2 + $0x30] sm:$0xff]  ;;  %v420_v15 = vmov 0   ;;  %vm180_vm0 = vcmask 392192  }
   0x7   :  { %116 = vmatpush.bf16.msra.mxu0 %v460_v0  ;;  %131 = vmatpush.bf16.msra.mxu1 %v460_v0  ;;  %v352_v2 = vld [vmem:[#allocation2 + $0x28] sm:$0xff]  ;;  %v351_v3 = vld [vmem:[#allocation2 + $0x20] sm:$0xff]  ;;  %v350_v4 = vld [vmem:[#allocation2 + $0x18] sm:$0xff]  ;;  %vm269_vm1 = vcmask 785408   ;;  %s421_s19 = smov [#allocation5]   ;;  %s294_s23 = sshll.u32 %s511_s6, 4  ;;  %s295_s23 = int_to_ptr.hbm [resolvable:$true] %s294_s23 }
   0x8   :  { %214 = vmatpush.bf16.msra.mxu3 %v460_v0  ;;  %v349_v5 = vld [vmem:[#allocation2 + $0x10] sm:$0xff]  ;;  %v348_v6 = vld [vmem:[#allocation2 + $0x8] sm:$0xff]  ;;  %v347_v7 = vld [vmem:[#allocation2] sm:$0xff]  ;;  %362 = vset.pattern.permute.xlu0 %v420_v15  ;;  %s292_s20 = sshll.u32 %s421_s19, 4  ;;  %s293_s20 = int_to_ptr.vmem [resolvable:$true] %s292_s20 }
   0x9   :  { %v57_v8 = vld [vmem:[%s506_s1] sm:$0xff]  ;;  %v58_v9 = vld [vmem:[%s506_s1 + $0x8] sm:$0xff]  ;;  %363 = vset.pattern.permute.xlu1 %v420_v15  ;;  %364 = vset.pattern.permute.xlu2 %v420_v15  ;;  %v65_v21 = vld [vmem:[%s508_s3 + $0x10] sm:$0xff] }
   0xa   :  { %v67_v10 = vpack.c.bf16 %v58_v9, %v57_v8  ;;  %v63_v14 = vld [vmem:[%s508_s3] sm:$0xff]  ;;  %v64_v20 = vld [vmem:[%s508_s3 + $0x8] sm:$0xff]  ;;  %162 = vperm.xlu1 %363, %v65_v21   ;;  %v66_v25 = vld [vmem:[%s508_s3 + $0x18] sm:$0xff] }
   0xb   :  { %117 = vmatpush.bf16.msra.mxu0 %v463_v1  ;;  %132 = vmatpush.bf16.msra.mxu1 %v463_v1  ;;  %v355_v26 = vld [vmem:[%s507_s2] sm:$0xff]  ;;  %v356_v27 = vld [vmem:[%s507_s2 + $0x8] sm:$0xff] }
   0xc   :  { %215 = vmatpush.bf16.msra.mxu3 %v463_v1  ;;  %152 = vperm.xlu0 %362, %v63_v14   ;;  %v211_v55 = vld [vmem:[%s510_s5] sm:$0xff] }
   0xd   :  { %266 = vperm.xlu2 %364, %v211_v55  }
   0xf   :  { %118 = vmatpush.bf16.msra.mxu0 %v352_v2  ;;  %133 = vmatpush.bf16.msra.mxu1 %v352_v2 }
  0x10   :  { %216 = vmatpush.bf16.msra.mxu3 %v352_v2 }
  0x12   :  { %167 = vperm.xlu1 %363, %v66_v25  }
  0x13   :  { %119 = vmatpush.bf16.msra.mxu0 %v351_v3  ;;  %134 = vmatpush.bf16.msra.mxu1 %v351_v3 }
  0x14   :  { %217 = vmatpush.bf16.msra.mxu3 %v351_v3  ;;  %157 = vperm.xlu0 %362, %v64_v20  }
  0x17   :  { %120 = vmatpush.bf16.msra.mxu0 %v350_v4  ;;  %135 = vmatpush.bf16.msra.mxu1 %v350_v4 }
  0x18   :  { %218 = vmatpush.bf16.msra.mxu3 %v350_v4 }
  0x1b   :  { %121 = vmatpush.bf16.msra.mxu0 %v349_v5  ;;  %136 = vmatpush.bf16.msra.mxu1 %v349_v5 }
  0x1c   :  { %219 = vmatpush.bf16.msra.mxu3 %v349_v5 }
  0x1f   :  { %122 = vmatpush.bf16.msra.mxu0 %v348_v6  ;;  %137 = vmatpush.bf16.msra.mxu1 %v348_v6 }
  0x20   :  { %220 = vmatpush.bf16.msra.mxu3 %v348_v6 }
  0x23   :  { %123 = vmatpush.bf16.msra.mxu0 %v347_v7  ;;  %138 = vmatpush.bf16.msra.mxu1 %v347_v7 }
  0x24   :  { %221 = vmatpush.bf16.msra.mxu3 %v347_v7 }
  0x26   :  { %124 = vmatmul.bf16.vlgmr.msra.gmra.mxu0 %v67_v10 }
  0x7c   :  { %v163_v37 = vpop.permute.xlu1 %162 }
  0x7e   :  { %v153_v28 = vpop.permute.xlu0 %152 }
  0x84   :  { %v168_v40 = vpop.permute.xlu1 %167 }
  0x86   :  { %v158_v31 = vpop.permute.xlu0 %157 }
  0xa3   :  { %v125_v11 = vpop.f32.mrf.mxu0 }
  0xab   :  { %v127_v12 = vpop.f32.mrf.mxu0 }
  0xac   :  { %v130_v13 = vpack.c.bf16 %v127_v12, %v125_v11 }
  0xae   :  { %139 = vmatmul.bf16.vlgmr.msra.gmra.mxu1 %v130_v13 }
 0x12b   :  { %v140_v16 = vpop.f32.mrf.mxu1 }
 0x12c   :  { %v145_v17 = vmul.f32 2.0, %v140_v16 }
 0x12e   :  { %v147_v23 = vsub.f32 %v145_v17, %v57_v8 }
 0x133   :  { %v142_v18 = vpop.f32.mrf.mxu1 }
 0x134   :  { %v146_v19 = vmul.f32 2.0, %v142_v18 }
 0x136   :  { %v148_v22 = vsub.f32 %v146_v19, %v58_v9 }
 0x138   :  { %v149_v24 = vpack.c.bf16 %v148_v22, %v147_v23 }
 0x13a   :  { %192 = vmatpush.bf16.msra.mxu2 %v149_v24 }
 0x13e   :  { %193 = vmatpush.bf16.msra.mxu2 %v130_v13 }
 0x142   :  { %194 = vmatpush.bf16.msra.mxu2 %v67_v10 }
 0x145   :  { %344 = vmatmul.msk.bf16.vlgmr.msra.gmra.mxu2 %vm180_vm0, %v355_v26 }
 0x146   :  { %235 = vmatpush.bf16.msrb.mxu2 %v460_v0 }
 0x14a   :  { %236 = vmatpush.bf16.msrb.mxu2 %v463_v1 }
 0x14e   :  { %237 = vmatpush.bf16.msrb.mxu2 %v352_v2 }
 0x152   :  { %238 = vmatpush.bf16.msrb.mxu2 %v351_v3  ;;  %v210_v3 = vld [vmem:[%s509_s4] sm:$0xf] }
 0x155   :  { %345 = vmatmul.msk.bf16.gmra.mxu2 %vm180_vm0, %v356_v27 }
 0x156   :  { %239 = vmatpush.bf16.msrb.mxu2 %v350_v4  ;;  %v267_v4 = vpop.permute.xlu2 %266 }
 0x15a   :  { %240 = vmatpush.bf16.msrb.mxu2 %v349_v5 }
 0x15e   :  { %241 = vmatpush.bf16.msrb.mxu2 %v348_v6 }
 0x162   :  { %242 = vmatpush.bf16.msrb.mxu2 %v347_v7 }
 0x1c8   :  { %v196_v29 = vpop.f32.mrf.mxu2 }
 0x1c9   :  { %v197_v30 = vadd.f32 %v196_v29, %v153_v28 }
 0x1cb   :  { %v206_v34 = vmax.f32 %v197_v30, 0.0 }
 0x1d0   :  { %v198_v32 = vpop.f32.mrf.mxu2 }
 0x1d1   :  { %v199_v33 = vadd.f32 %v198_v32, %v158_v31 }
 0x1d3   :  { %v207_v35 = vmax.f32 %v199_v33, 0.0 }
 0x1d5   :  { %v212_v36 = vpack.c.bf16 %v207_v35, %v206_v34 }
 0x1d7   :  { %222 = vmatmul.bf16.vlgmr.msra.gmra.mxu3 %v212_v36 }
 0x1d8   :  { %v201_v38 = vpop.f32.mrf.mxu2 }
 0x1d9   :  { %v202_v39 = vadd.f32 %v201_v38, %v163_v37 }
 0x1db   :  { %v208_v43 = vmax.f32 %v202_v39, 0.0 }
 0x1e0   :  { %v203_v41 = vpop.f32.mrf.mxu2 }
 0x1e1   :  { %v204_v42 = vadd.f32 %v203_v41, %v168_v40 }
 0x1e3   :  { %v209_v44 = vmax.f32 %v204_v42, 0.0 }
 0x1e5   :  { %v213_v45 = vpack.c.bf16 %v209_v44, %v208_v43 }
 0x1e7   :  { %227 = vmatmul.bf16.gmra.mxu3 %v213_v45 }
 0x25a   :  { %v223_v46 = vpop.f32.mrf.mxu3 }
 0x262   :  { %v225_v47 = vpop.f32.mrf.mxu3 }
 0x263   :  { %v233_v48 = vpack.c.bf16 %v225_v47, %v223_v46 }
 0x265   :  { %243 = vmatmul.bf16.vlgmr.msrb.gmra.mxu2 %v233_v48 }
 0x26a   :  { %v228_v49 = vpop.f32.mrf.mxu3 }
 0x272   :  { %v230_v50 = vpop.f32.mrf.mxu3 }
 0x273   :  { %v234_v51 = vpack.c.bf16 %v230_v50, %v228_v49 }
 0x275   :  { %248 = vmatmul.bf16.gmra.mxu2 %v234_v51 }
 0x2e8   :  { %v244_v52 = vpop.f32.mrf.mxu2 }
 0x2e9   :  { %v254_v60 = vmul.f32 2.0, %v244_v52 }
 0x2eb   :  { %v258_v1 = vsub.f32 %v254_v60, %v206_v34 }
 0x2f0   :  { %v246_v53 = vpop.f32.mrf.mxu2 }
 0x2f1   :  { %v255_v58 = vmul.f32 2.0, %v246_v53 }
 0x2f3   :  { %v259_v63 = vsub.f32 %v255_v58, %v207_v35 }
 0x2f5   :  { %v262_v2 = vpack.c.bf16 %v259_v63, %v258_v1 }
 0x2f8   :  { %v249_v54 = vpop.f32.mrf.mxu2 }
 0x2f9   :  { %v256_v56 = vmul.f32 2.0, %v249_v54 }
 0x2fb   :  { %v260_v61 = vsub.f32 %v256_v56, %v208_v43 }
 0x300   :  { %v251_v57 = vpop.f32.mrf.mxu2 }
 0x301   :  { %v257_v59 = vmul.f32 2.0, %v251_v57 }
 0x303   :  { %v261_v62 = vsub.f32 %v257_v59, %v209_v44 }
 0x305   :  { %v263_v0 = vpack.c.bf16 %v261_v62, %v260_v61 }
 0x307   :  { %275 = vmatpush.bf16.msrb.mxu0 %v263_v0 }
 0x30b   :  { %276 = vmatpush.bf16.msrb.mxu0 %v262_v2 }
 0x30f   :  { %277 = vmatpush.bf16.msrb.mxu0 %v234_v51 }
 0x313   :  { %278 = vmatpush.bf16.msrb.mxu0 %v233_v48 }
 0x317   :  { %279 = vmatpush.bf16.msrb.mxu0 %v213_v45 }
 0x31b   :  { %280 = vmatpush.bf16.msrb.mxu0 %v212_v36 }
 0x31e   :  { %346 = vmatmul.msk.bf16.vlgmr.msrb.gmra.mxu0 %vm269_vm1, %v210_v3 }
 0x39b   :  { %v282_v5 = vpop.f32.mrf.mxu0 }
 0x39c   :  { %v283_v6 = vadd.f32 %v282_v5, %v267_v4 }
 0x39e   :  { %286 = vst [vmem:[#allocation5] sm:$0xff] %v283_v6 }
 0x39f   :  { %297 = dma.vmem_to_hbm [thread:$0]  %s293_s20, 128, %s295_s23, [#allocation4]  }
 0x3a3   :  { %v284_v7 = vpop.f32.mrf.mxu0 }
 0x3a4   :  { %415 = dma.done.wait [#allocation4], 128  }
 0x3a5   :  { %416 = vsyncadd [#allocation4], 4294967168 }
 0x3a6   :  { %302 = vsyncpa [#allocation3], 1 }
 0x3a7   :  { %303 = vsyncpa [#allocation4], 1 }

</bundles_post_ra>
